<compile_context>
chip_gen: v7x
topology: tpu7x:2x2x1
jax: 0.10.0
libtpu: 0.0.40
codegen_flags: <defaults>
</compile_context>

<pallas_src>
import math

import jax
import jax.numpy as jnp
from jax.experimental import pallas as pl
from jax.experimental.pallas import tpu as pltpu


# ---------------------------------------------------------------------------
# Kernels
# ---------------------------------------------------------------------------

def _resident_kernel(x_ref, w1_ref, b1_ref, w2_ref, b2_ref, o_ref):
    """Weights fully VMEM-resident: fused fc1 -> ReLU -> fc2 for one row tile."""
    h = jnp.dot(x_ref[...], w1_ref[...], preferred_element_type=jnp.float32)
    h = jnp.maximum(h + b1_ref[...], 0.0)
    if w2_ref.dtype != jnp.float32:          # bf16 MXU path, f32 accumulation
        h = h.astype(w2_ref.dtype)
    y = jnp.dot(h, w2_ref[...], preferred_element_type=jnp.float32) + b2_ref[...]
    o_ref[...] = y.astype(o_ref.dtype)


def _streaming_kernel_f32out(x_ref, w1_ref, b1_ref, w2_ref, b2_ref, o_ref):
    """H-streamed reduction, accumulating directly into the f32 output tile."""
    j = pl.program_id(1)

    @pl.when(j == 0)
    def _():
        o_ref[...] = jnp.zeros_like(o_ref)

    h = jnp.dot(x_ref[...], w1_ref[...], preferred_element_type=jnp.float32)
    h = jnp.maximum(h + b1_ref[...], 0.0)
    if w2_ref.dtype != jnp.float32:
        h = h.astype(w2_ref.dtype)
    o_ref[...] += jnp.dot(h, w2_ref[...], preferred_element_type=jnp.float32)

    @pl.when(j == pl.num_programs(1) - 1)
    def _():
        o_ref[...] += b2_ref[...]


def _streaming_kernel_scratch(x_ref, w1_ref, b1_ref, w2_ref, b2_ref, o_ref,
                              acc_ref):
    """H-streamed reduction with an f32 scratch accumulator (non-f32 output)."""
    j = pl.program_id(1)

    @pl.when(j == 0)
    def _():
        acc_ref[...] = jnp.zeros_like(acc_ref)

    h = jnp.dot(x_ref[...], w1_ref[...], preferred_element_type=jnp.float32)
    h = jnp.maximum(h + b1_ref[...], 0.0)
    if w2_ref.dtype != jnp.float32:
        h = h.astype(w2_ref.dtype)
    acc_ref[...] += jnp.dot(h, w2_ref[...], preferred_element_type=jnp.float32)

    @pl.when(j == pl.num_programs(1) - 1)
    def _():
        o_ref[...] = (acc_ref[...] + b2_ref[...]).astype(o_ref.dtype)


# ---------------------------------------------------------------------------
# Tile / VMEM selection helpers
# ---------------------------------------------------------------------------

def _vmem_capacity_bytes():
    """Physical VMEM per core; falls back to 128 MiB if the query fails."""
    try:
        info = pltpu.get_tpu_info()
        cap = int(getattr(info, "vmem_capacity_bytes", 0) or 0)
        if cap > 0:
            return cap
    except Exception:
        pass
    return 128 * 1024 * 1024


def _shrink_candidates(t0):
    """Row-tile candidates, largest first: t0, 256-multiples below it, then
    small powers of two (all multiples of 8, so blocks stay layout-legal)."""
    cands = [t0]
    t = (t0 // 256) * 256
    while t >= 256:
        if t < t0:
            cands.append(t)
        t -= 256
    for t in (128, 64, 32, 16, 8):
        if t < t0:
            cands.append(t)
    return cands


def _choose_tm(M, target):
    """Prefer the full dim or a divisor of M (no padding); pad the ragged tail
    only when no reasonable divisor exists."""
    if M <= target:
        return M, M
    t = (target // 8) * 8
    while t >= 8:
        if M % t == 0:
            break
        t -= 8
    if t >= 8 and M % t == 0 and t >= max(128, target // 2):
        return t, M
    Mp = -(-M // target) * target
    return target, Mp


def _th_divisors(Hp):
    """Multiples of 128 dividing Hp, largest first."""
    return sorted((d for d in range(128, Hp + 1, 128) if Hp % d == 0),
                  reverse=True)


def _maybe_buffered(shape, index_map, nbuf):
    if nbuf > 2:
        try:
            return pl.BlockSpec(shape, index_map, pipeline_mode=pl.Buffered(nbuf))
        except TypeError:   # older jax without pipeline_mode: default 2 buffers
            pass
    return pl.BlockSpec(shape, index_map)


# ---------------------------------------------------------------------------
# Forward wrapper
# ---------------------------------------------------------------------------

def mlpx_forward(x, w1, b1, w2, b2, *, tm=None, th=None, force_streaming=False):
    """Fused fc1 -> ReLU -> fc2.  x: [M, IN] -> [M, OUT].
    Weights are pre-transposed vs torch.nn.Linear: w1 [IN, H], w2 [H, OUT];
    biases are [1, H] / [1, OUT]."""
    M, IN = x.shape
    H, OUT = w2.shape
    assert w1.shape == (IN, H) and b1.shape == (1, H) and b2.shape == (1, OUT)
    if not jnp.issubdtype(w1.dtype, jnp.floating):
        raise ValueError("only floating-point weights are supported (int8 needs "
                         "a scaled quant path; the v7x MXU has no int support)")
    # TODO(synk): the module builds LayerNorm/Dropout but forward() never uses
    # them, so they are intentionally not implemented.

    wdtype = w1.dtype
    if x.dtype != wdtype:                       # same-dtype contract for the MXU
        x = x.astype(wdtype)
    out_dtype = wdtype
    bpe = jnp.dtype(wdtype).itemsize
    out_bpe = jnp.dtype(out_dtype).itemsize
    cast_h = wdtype != jnp.float32

    # --- Per-generation VMEM budget: physical cap minus headroom. -----------
    cap = _vmem_capacity_bytes()
    budget = cap - max(8 * 1024 * 1024, cap // 8)   # 128MiB->112MiB, 64MiB->56MiB

    # Row-tile target large enough to beat the weight-streaming HBM roofline
    # (per-step intensity = 2*tm/bpe); 128-MiB parts (v5e/v6e) vs 64-MiB (v7x).
    tm_target = tm if tm is not None else (512 if cap <= 64 * 1024 * 1024 else 768)

    weight_bytes = (IN * H + H + H * OUT + OUT) * bpe

    def resident_bytes(tm_):
        b = 2 * weight_bytes                              # conservative 2 buffers
        b += 2 * tm_ * IN * bpe + 2 * tm_ * OUT * out_bpe
        b += tm_ * H * 4 + (tm_ * H * bpe if cast_h else 0)   # f32 h (+ cast copy)
        return b

    def streaming_bytes(tm_, th_, nwbuf):
        b = 2 * tm_ * IN * bpe                            # x tile, double-buffered
        b += nwbuf * (IN * th_ + th_ + th_ * OUT) * bpe   # W1 + b1 + W2 tiles
        b += 2 * OUT * bpe                                # b2
        b += 2 * tm_ * OUT * out_bpe                      # output tile
        if out_dtype != jnp.float32:
            b += tm_ * OUT * 4                            # f32 scratch accumulator
        b += tm_ * th_ * 4 + (tm_ * th_ * bpe if cast_h else 0)
        return b

    # ---------------- Weights-resident fast path ----------------
    if (not force_streaming) and 2 * weight_bytes <= budget:
        tm_sel, Mp = _choose_tm(M, tm_target)
        tm_fit = next((c for c in _shrink_candidates(tm_sel)
                       if resident_bytes(c) <= budget), None)
        if tm_fit is not None:
            tm_sel = tm_fit
            Mp = M if tm_sel >= M else -(-M // tm_sel) * tm_sel
            xp = jnp.pad(x, ((0, Mp - M), (0, 0))) if Mp != M else x
            cost = pl.CostEstimate(
                flops=2 * Mp * H * (IN + OUT),
                transcendentals=0,
                bytes_accessed=Mp * IN * bpe + weight_bytes + Mp * OUT * out_bpe)
            out = pl.pallas_call(
                _resident_kernel,
                out_shape=jax.ShapeDtypeStruct((Mp, OUT), out_dtype),
                grid_spec=pltpu.PrefetchScalarGridSpec(
                    num_scalar_prefetch=0,
                    grid=(Mp // tm_sel,),
                    in_specs=[
                        pl.BlockSpec((tm_sel, IN), lambda i: (i, 0)),
                        pl.BlockSpec((IN, H), lambda i: (0, 0)),   # DMA'd once
                        pl.BlockSpec((1, H), lambda i: (0, 0)),
                        pl.BlockSpec((H, OUT), lambda i: (0, 0)),  # DMA'd once
                        pl.BlockSpec((1, OUT), lambda i: (0, 0)),
                    ],
                    out_specs=pl.BlockSpec((tm_sel, OUT), lambda i: (i, 0)),
                ),
                compiler_params=pltpu.CompilerParams(
                    dimension_semantics=("parallel",),
                    vmem_limit_bytes=int(budget)),
                cost_estimate=cost,
            )(xp, w1, b1, w2, b2)
            return out[:M] if Mp != M else out

    # ---------------- H-streaming reduction path ----------------
    # Pad H to a multiple of 128 if needed; zero hidden units are exact no-ops
    # (relu(x @ 0 + 0) = 0 and 0 @ w2_pad contributes 0).
    Hp = -(-H // 128) * 128
    if Hp != H:
        w1 = jnp.pad(w1, ((0, 0), (0, Hp - H)))
        b1 = jnp.pad(b1, ((0, 0), (0, Hp - H)))
        w2 = jnp.pad(w2, ((0, Hp - H), (0, 0)))

    if th is not None and th % 128 == 0 and Hp % th == 0:
        th_divs = [th]
    else:
        th_divs = _th_divisors(Hp)

    tm_sel, _ = _choose_tm(M, tm_target)
    chosen = None
    for cand_tm in _shrink_candidates(tm_sel):
        for nb in (3, 2):
            th_fit = next((d for d in th_divs
                           if streaming_bytes(cand_tm, d, nb) <= budget), None)
            if th_fit is not None:
                chosen = (cand_tm, th_fit, nb)
                break
        if chosen is not None:
            break
    if chosen is None:                          # last resort: smallest legal tiles
        chosen = (8, min(th_divs), 2)
    tm_sel, th_sel, nwbuf = chosen
    Mp = M if tm_sel >= M else -(-M // tm_sel) * tm_sel
    xp = jnp.pad(x, ((0, Mp - M), (0, 0))) if Mp != M else x

    f32_out = out_dtype == jnp.float32
    kernel = _streaming_kernel_f32out if f32_out else _streaming_kernel_scratch
    scratch = [] if f32_out else [pltpu.VMEM((tm_sel, OUT), jnp.float32)]

    n_row_tiles = Mp // tm_sel
    cost = pl.CostEstimate(
        flops=2 * Mp * Hp * (IN + OUT),
        transcendentals=0,
        bytes_accessed=(Mp * IN * bpe
                        + n_row_tiles * (IN * Hp + Hp + Hp * OUT) * bpe
                        + OUT * bpe + Mp * OUT * out_bpe))

    out = pl.pallas_call(
        kernel,
        out_shape=jax.ShapeDtypeStruct((Mp, OUT), out_dtype),
        grid_spec=pltpu.PrefetchScalarGridSpec(
            num_scalar_prefetch=0,
            grid=(n_row_tiles, Hp // th_sel),
            in_specs=[
                pl.BlockSpec((tm_sel, IN), lambda i, j: (i, 0)),      # x row tile
                _maybe_buffered((IN, th_sel), lambda i, j: (0, j), nwbuf),   # W1
                pl.BlockSpec((1, th_sel), lambda i, j: (0, j)),       # b1 tile
                _maybe_buffered((th_sel, OUT), lambda i, j: (j, 0), nwbuf),  # W2
                pl.BlockSpec((1, OUT), lambda i, j: (0, 0)),          # b2
            ],
            out_specs=pl.BlockSpec((tm_sel, OUT), lambda i, j: (i, 0)),
            scratch_shapes=scratch,
        ),
        compiler_params=pltpu.CompilerParams(
            dimension_semantics=("parallel", "arbitrary"),
            vmem_limit_bytes=int(budget)),
        cost_estimate=cost,
    )(xp, w1, b1, w2, b2)
    return out[:M] if Mp != M else out


# ---------------------------------------------------------------------------
# Parameter init matching the module's init_weights()
# ---------------------------------------------------------------------------

def init_params(key, in_features, h_features, out_features, dtype=jnp.float32):
    """fc1: kaiming_normal_(relu) -> std = sqrt(2/fan_in); fc2: xavier_normal_
    -> std = sqrt(2/(fan_in+fan_out)); biases zero.  Weights stored transposed
    vs torch's Linear.weight so the kernel does plain x @ W."""
    k1, k2 = jax.random.split(key)
    std1 = math.sqrt(2.0 / in_features)
    std2 = math.sqrt(2.0 / (h_features + out_features))
    w1 = (jax.random.normal(k1, (in_features, h_features)) * std1).astype(dtype)
    b1 = jnp.zeros((1, h_features), dtype)
    w2 = (jax.random.normal(k2, (h_features, out_features)) * std2).astype(dtype)
    b2 = jnp.zeros((1, out_features), dtype)
    return w1, b1, w2, b2


if __name__ == "__main__":
    key = jax.random.PRNGKey(0)
    kx, kp, kx2, kp2, kx3, kp3 = jax.random.split(key, 6)

    # --- Test 1: module-consistent small shapes (weights-resident path). ----
    B, S = 2, 8
    IN, HID, OUT = 32, 64, 32
    x3 = jax.random.normal(kx, (B, S, IN), dtype=jnp.float32)
    w1, b1, w2, b2 = init_params(kp, IN, HID, OUT)

    x2 = x3.reshape(B * S, IN)               # nn.Linear acts on the last axis
    out = mlpx_forward(x2, w1, b1, w2, b2).reshape(B, S, OUT)
    jax.block_until_ready(out)

    ref = jnp.maximum(x3 @ w1 + b1[0], 0.0) @ w2 + b2[0]
    assert jnp.allclose(out, ref, atol=1e-2, rtol=1e-2), "mismatch (resident)"

    # --- Test 2: H-streaming path, f32 accumulate-into-output (no scratch). -
    M2, IN2, H2, O2 = 384, 256, 512, 256
    xb = jax.random.normal(kx2, (M2, IN2), dtype=jnp.float32)
    w1b, b1b, w2b, b2b = init_params(kp2, IN2, H2, O2)

    outb = mlpx_forward(xb, w1b, b1b, w2b, b2b, tm=128, th=256,
                        force_streaming=True)
    jax.block_until_ready(outb)

    refb = jnp.maximum(xb @ w1b + b1b[0], 0.0) @ w2b + b2b[0]
    assert jnp.allclose(outb, refb, atol=2e-2, rtol=2e-2), "mismatch (stream f32)"

    # --- Test 3: bf16 weights, H-streaming with f32 scratch accumulator. ----
    M3, IN3, H3, O3 = 128, 128, 256, 128
    xc = jax.random.normal(kx3, (M3, IN3), dtype=jnp.float32)
    w1c, b1c, w2c, b2c = init_params(kp3, IN3, H3, O3, dtype=jnp.bfloat16)

    outc = mlpx_forward(xc, w1c, b1c, w2c, b2c, tm=64, th=128,
                        force_streaming=True)
    jax.block_until_ready(outc)

    xcq = xc.astype(jnp.bfloat16).astype(jnp.float32)
    refc = (jnp.maximum(xcq @ w1c.astype(jnp.float32) + b1c[0].astype(jnp.float32),
                        0.0)
            @ w2c.astype(jnp.float32) + b2c[0].astype(jnp.float32))
    assert jnp.allclose(outc.astype(jnp.float32), refc, atol=1.5e-1, rtol=1e-1), \
        "mismatch (stream bf16)"

    print("KERNEL_OK")
</pallas_src>

<mosaic_0001>
module attributes {stable_mosaic.version = 11 : i64} {
  func.func @_resident_kernel(%arg0: i32, %arg1: memref<16x32xf32, #tpu.memory_space<vmem>>, %arg2: memref<32x64xf32, #tpu.memory_space<vmem>>, %arg3: memref<1x64xf32, #tpu.memory_space<vmem>>, %arg4: memref<64x32xf32, #tpu.memory_space<vmem>>, %arg5: memref<1x32xf32, #tpu.memory_space<vmem>>, %arg6: memref<16x32xf32, #tpu.memory_space<vmem>>) attributes {dimension_semantics = [#tpu.dimension_semantics<parallel>], iteration_bounds = array<i64: 1>, scalar_prefetch = 0 : i64, scratch_operands = 0 : i64, tpu.core_type = #tpu.core_type<tc>, window_params = [{transform_indices = @transform_0, window_bounds = array<i64: 16, 32>}, {pipeline_mode = #tpu.pipeline_mode<synchronous>, transform_indices = @transform_1, window_bounds = array<i64: 32, 64>}, {pipeline_mode = #tpu.pipeline_mode<synchronous>, transform_indices = @transform_2, window_bounds = array<i64: 1, 64>}, {pipeline_mode = #tpu.pipeline_mode<synchronous>, transform_indices = @transform_3, window_bounds = array<i64: 64, 32>}, {pipeline_mode = #tpu.pipeline_mode<synchronous>, transform_indices = @transform_4, window_bounds = array<i64: 1, 32>}, {transform_indices = @transform_5, window_bounds = array<i64: 16, 32>}]} {
    %c0 = arith.constant 0 : index
    %c0_0 = arith.constant 0 : index
    %0 = vector.load %arg1[%c0, %c0_0] : memref<16x32xf32, #tpu.memory_space<vmem>>, vector<16x32xf32>
    %c0_1 = arith.constant 0 : index
    %c0_2 = arith.constant 0 : index
    %1 = vector.load %arg2[%c0_1, %c0_2] : memref<32x64xf32, #tpu.memory_space<vmem>>, vector<32x64xf32>
    %cst = arith.constant dense<0.000000e+00> : vector<16x64xf32>
    %2 = tpu.matmul %0, %1, %cst {dimension_numbers = #tpu.dot_dimension_numbers<[1], [0], [0], [1], [0, 0, 1, 1], [], []>} : vector<16x32xf32>, vector<32x64xf32>, vector<16x64xf32> -> vector<16x64xf32>
    %c0_3 = arith.constant 0 : index
    %c0_4 = arith.constant 0 : index
    %3 = vector.load %arg3[%c0_3, %c0_4] : memref<1x64xf32, #tpu.memory_space<vmem>>, vector<1x64xf32>
    %4 = vector.broadcast %3 : vector<1x64xf32> to vector<16x64xf32>
    %5 = arith.addf %2, %4 : vector<16x64xf32>
    %cst_5 = arith.constant 0.000000e+00 : f32
    %6 = vector.broadcast %cst_5 : f32 to vector<16x64xf32>
    %7 = arith.maximumf %5, %6 : vector<16x64xf32>
    %c0_6 = arith.constant 0 : index
    %c0_7 = arith.constant 0 : index
    %8 = vector.load %arg4[%c0_6, %c0_7] : memref<64x32xf32, #tpu.memory_space<vmem>>, vector<64x32xf32>
    %cst_8 = arith.constant dense<0.000000e+00> : vector<16x32xf32>
    %9 = tpu.matmul %7, %8, %cst_8 {dimension_numbers = #tpu.dot_dimension_numbers<[1], [0], [0], [1], [0, 0, 1, 1], [], []>} : vector<16x64xf32>, vector<64x32xf32>, vector<16x32xf32> -> vector<16x32xf32>
    %c0_9 = arith.constant 0 : index
    %c0_10 = arith.constant 0 : index
    %10 = vector.load %arg5[%c0_9, %c0_10] : memref<1x32xf32, #tpu.memory_space<vmem>>, vector<1x32xf32>
    %11 = vector.broadcast %10 : vector<1x32xf32> to vector<16x32xf32>
    %12 = arith.addf %9, %11 : vector<16x32xf32>
    %c0_11 = arith.constant 0 : index
    %c0_12 = arith.constant 0 : index
    %13 = vector.load %arg6[%c0_11, %c0_12] : memref<16x32xf32, #tpu.memory_space<vmem>>, vector<16x32xf32>
    tpu.vector_store %arg6[%c0_11, %c0_12], %12 {strides = array<i32>} : memref<16x32xf32, #tpu.memory_space<vmem>>, vector<16x32xf32>,
    return
  }
  func.func @transform_0(%arg0: i32) -> (i32, i32) {
    %c0_i32 = arith.constant 0 : i32
    %c0_i32_0 = arith.constant 0 : i32
    return %arg0, %c0_i32 : i32, i32
  }
  func.func @transform_1(%arg0: i32) -> (i32, i32) {
    %c0_i32 = arith.constant 0 : i32
    %c0_i32_0 = arith.constant 0 : i32
    %c0_i32_1 = arith.constant 0 : i32
    return %c0_i32, %c0_i32_0 : i32, i32
  }
  func.func @transform_2(%arg0: i32) -> (i32, i32) {
    %c0_i32 = arith.constant 0 : i32
    %c0_i32_0 = arith.constant 0 : i32
    %c0_i32_1 = arith.constant 0 : i32
    return %c0_i32, %c0_i32_0 : i32, i32
  }
  func.func @transform_3(%arg0: i32) -> (i32, i32) {
    %c0_i32 = arith.constant 0 : i32
    %c0_i32_0 = arith.constant 0 : i32
    %c0_i32_1 = arith.constant 0 : i32
    return %c0_i32, %c0_i32_0 : i32, i32
  }
  func.func @transform_4(%arg0: i32) -> (i32, i32) {
    %c0_i32 = arith.constant 0 : i32
    %c0_i32_0 = arith.constant 0 : i32
    %c0_i32_1 = arith.constant 0 : i32
    return %c0_i32, %c0_i32_0 : i32, i32
  }
  func.func @transform_5(%arg0: i32) -> (i32, i32) {
    %c0_i32 = arith.constant 0 : i32
    %c0_i32_0 = arith.constant 0 : i32
    return %arg0, %c0_i32 : i32, i32
  }
}

</mosaic_0001>

<bundles_post_ra>
// kernel: tpu_custom_call.1
= control target key start
LH: loop header
LB: loop body
LE: loop exit
PB: predicated region body
PF: predicated region fallthrough
CT: control target
= control target key end

     0   :  { %10 = vsyncpa [#allocation3], 0  ;;  %s657_s0 = inlined_call_operand.hbm [shape: f32[16,32], index: 0, kind: input, shape index: {}]   ;;  %s658_s1 = inlined_call_operand.hbm [shape: f32[32,64], index: 1, kind: input, shape index: {}]   ;;  %s659_s2 = inlined_call_operand.hbm [shape: f32[1,64], index: 2, kind: input, shape index: {}]   ;;  %s660_s3 = inlined_call_operand.hbm [shape: f32[64,32], index: 3, kind: input, shape index: {}]   ;;  %s661_s4 = inlined_call_operand.hbm [shape: f32[1,32], index: 4, kind: input, shape index: {}]   ;;  %s662_s5 = inlined_call_operand.hbm [shape: f32[16,32], index: 5, kind: output, shape index: {}]  }
   0x1   :  { %11 = vsyncpa [#allocation6], 0 }
   0x2   :  { %12 = vsyncpa [#allocation9], 0 }
   0x3   :  { %13 = vsyncpa [#allocation4], 0  ;;  %s524_s18 = smov [#allocation5]   ;;  %s525_s20 = smov [#allocation8]  }
   0x4   :  { %s31_s19 = sshll.u32 %s524_s18, 4  ;;  %s53_s21 = sshll.u32 %s525_s20, 4  ;;  %s32_s19 = int_to_ptr.vmem [resolvable:$true] %s31_s19  ;;  %s562_s21 = int_to_ptr.vmem [resolvable:$true] %s53_s21 }
   0x5   :  { %s384_s24 = scalar_lea.hbm %s658_s1, 512 }
   0x6   :  { %p385_p0 = scmp.ne.s32.totalorder %s658_s1, %s384_s24  ;;  %p388_p1 = scmp.lt.u32.totalorder %s384_s24, %s658_s1 }
   0x8   :  { %p390_p2 = pnand %p388_p1, %p385_p0 }
   0xa   :  { %393 = shalt.err (!%p390_p2)
}
   0xb   :  { %s394_s29 = scalar_lea.vmem %s32_s19, 512  ;;  %p399_p4 = scmp.lt.s32.totalorder %s32_s19, %s32_s19 }
   0xc   :  { %p395_p3 = scmp.ne.s32.totalorder %s32_s19, %s394_s29  ;;  %p400_p5 = scmp.lt.s32.totalorder %s394_s29, %s394_s29 }
   0xe   :  { %p401_p6 = por %p400_p5, %p399_p4 }
  0x10   :  { %p402_p7 = pnand %p401_p6, %p395_p3 }
  0x12   :  { %405 = shalt.err (!%p402_p7)
}
  0x13   :  { %s526_s30 = smov 128   ;;  %s527_s6 = smov 8  }
  0x14   :  { %37 = dma.hbm_to_vmem [thread:$0]  %s658_s1, 512, %s32_s19, [#allocation6], %s526_s30, %s526_s30, %s527_s6  }
  0x15   :  { %s406_s11 = scalar_lea.hbm %s660_s3, 1024 }
  0x16   :  { %p407_p8 = scmp.ne.s32.totalorder %s660_s3, %s406_s11  ;;  %p410_p9 = scmp.lt.u32.totalorder %s406_s11, %s660_s3 }
  0x18   :  { %p412_p10 = pnand %p410_p9, %p407_p8 }
  0x1a   :  { %415 = shalt.err (!%p412_p10)
}
  0x1b   :  { %s416_s16 = scalar_lea.vmem %s562_s21, 1024  ;;  %p421_p12 = scmp.lt.s32.totalorder %s562_s21, %s562_s21 }
  0x1c   :  { %p417_p11 = scmp.ne.s32.totalorder %s562_s21, %s416_s16  ;;  %p422_p13 = scmp.lt.s32.totalorder %s416_s16, %s416_s16 }
  0x1e   :  { %p423_p0 = por %p422_p13, %p421_p12 }
  0x20   :  { %p424_p1 = pnand %p423_p0, %p417_p11 }
  0x22   :  { %427 = shalt.err (!%p424_p1)
}
  0x23   :  { %59 = dma.hbm_to_vmem [thread:$0]  %s660_s3, 1024, %s562_s21, [#allocation9], %s526_s30, %s526_s30, %s527_s6  }
  0x24   :  { %s528_s18 = smov [#allocation2]   ;;  %s529_s20 = smov [#allocation7]  }
  0x25   :  { %s19_s19 = sshll.u32 %s528_s18, 4  ;;  %s44_s22 = sshll.u32 %s529_s20, 4  ;;  %s20_s19 = int_to_ptr.vmem [resolvable:$true] %s19_s19  ;;  %s45_s22 = int_to_ptr.vmem [resolvable:$true] %s44_s22 }
  0x26   :  { %s428_s25 = scalar_lea.hbm %s657_s0, 256 }
  0x27   :  { %p429_p2 = scmp.ne.s32.totalorder %s657_s0, %s428_s25  ;;  %p432_p3 = scmp.lt.u32.totalorder %s428_s25, %s657_s0 }
  0x29   :  { %p434_p4 = pnand %p432_p3, %p429_p2 }
  0x2b   :  { %437 = shalt.err (!%p434_p4)
}
  0x2c   :  { %s438_s3 = scalar_lea.vmem %s20_s19, 256  ;;  %p443_p6 = scmp.lt.s32.totalorder %s20_s19, %s20_s19 }
  0x2d   :  { %p439_p5 = scmp.ne.s32.totalorder %s20_s19, %s438_s3  ;;  %p444_p7 = scmp.lt.s32.totalorder %s438_s3, %s438_s3 }
  0x2f   :  { %p445_p8 = por %p444_p7, %p443_p6 }
  0x31   :  { %p446_p9 = pnand %p445_p8, %p439_p5 }
  0x33   :  { %449 = shalt.err (!%p446_p9)
}
  0x34   :  { %25 = dma.hbm_to_vmem [thread:$0]  %s657_s0, 256, %s20_s19, [#allocation3], %s526_s30, %s526_s30, %s527_s6  }
  0x35   :  { %s450_s10 = scalar_lea.hbm %s659_s2, 16 }
  0x36   :  { %p451_p10 = scmp.ne.s32.totalorder %s659_s2, %s450_s10  ;;  %p454_p11 = scmp.lt.u32.totalorder %s450_s10, %s659_s2 }
  0x38   :  { %p456_p12 = pnand %p454_p11, %p451_p10 }
  0x3a   :  { %459 = shalt.err (!%p456_p12)
}
  0x3b   :  { %s460_s15 = scalar_lea.vmem %s45_s22, 16  ;;  %s464_s16 = scalar_lea.vmem %s45_s22, 32 }
  0x3c   :  { %p461_p13 = scmp.ne.s32.totalorder %s45_s22, %s460_s15  ;;  %p465_p0 = scmp.lt.s32.totalorder %s45_s22, %s45_s22 }
  0x3d   :  { %p466_p1 = scmp.lt.s32.totalorder %s464_s16, %s460_s15 }
  0x3f   :  { %p467_p2 = por %p466_p1, %p465_p0 }
  0x41   :  { %p468_p3 = pnand %p467_p2, %p461_p13 }
  0x43   :  { %471 = shalt.err (!%p468_p3)
}
  0x44   :  { %47 = dma.hbm_to_vmem [thread:$0]  %s659_s2, 16, %s45_s22, [#allocation6]  }
  0x45   :  { %s530_s17 = smov [#allocation10]   ;;  %s472_s23 = scalar_lea.hbm %s661_s4, 16 }
  0x46   :  { %s66_s18 = sshll.u32 %s530_s17, 4  ;;  %p473_p4 = scmp.ne.s32.totalorder %s661_s4, %s472_s23  ;;  %s67_s18 = int_to_ptr.vmem [resolvable:$true] %s66_s18 }
  0x47   :  { %p476_p5 = scmp.lt.u32.totalorder %s472_s23, %s661_s4 }
  0x49   :  { %p478_p6 = pnand %p476_p5, %p473_p4 }
  0x4b   :  { %481 = shalt.err (!%p478_p6)
}
  0x4c   :  { %s482_s28 = scalar_lea.vmem %s67_s18, 16  ;;  %s486_s2 = scalar_lea.vmem %s67_s18, 32 }
  0x4d   :  { %p483_p7 = scmp.ne.s32.totalorder %s67_s18, %s482_s28  ;;  %p487_p8 = scmp.lt.s32.totalorder %s67_s18, %s67_s18 }
  0x4e   :  { %p488_p9 = scmp.lt.s32.totalorder %s486_s2, %s482_s28 }
  0x50   :  { %p489_p10 = por %p488_p9, %p487_p8 }
  0x52   :  { %p490_p11 = pnand %p489_p10, %p483_p7 }
  0x54   :  { %493 = shalt.err (!%p490_p11)
}
  0x55   :  { %69 = dma.hbm_to_vmem [thread:$0]  %s661_s4, 16, %s67_s18, [#allocation9]  }
  0x56   :  { %516 = dma.done.wait [#allocation3], 256  }
  0x57   :  { %517 = vsyncadd [#allocation3], 4294967040 }
  0x58   :  { %518 = dma.done.wait [#allocation6], 528  }
  0x59   :  { %519 = vsyncadd [#allocation6], 4294966768 }
  0x5a   :  { %520 = dma.done.wait [#allocation9], 1040  }
  0x5b   :  { %521 = vsyncadd [#allocation9], 4294966256  ;;  %vm98_vm0 = vcmask 261120   ;;  %v87_v0 = vld [vmem:[#allocation5] sm:$0xff]  ;;  %v88_v1 = vld [vmem:[#allocation5 + $0x8] sm:$0xff]  ;;  %vm197_vm1 = vcmask 523264  }
  0x5c   :  { %v89_v2 = vld [vmem:[#allocation5 + $0x10] sm:$0xff]  ;;  %v352_v3 = vpack.c.bf16 %v88_v1, %v87_v0  ;;  %v90_v4 = vld [vmem:[#allocation5 + $0x18] sm:$0xff]  ;;  %v182_v7 = vld [vmem:[#allocation8] sm:$0xff]  ;;  %s531_s4 = smov [#allocation11]  }
  0x5d   :  { %v85_v5 = vld [vmem:[#allocation2] sm:$0xff]  ;;  %v356_v6 = vpack.c.bf16 %v90_v4, %v89_v2  ;;  %v185_v11 = vld [vmem:[#allocation8 + $0x18] sm:$0xff]  ;;  %v186_v13 = vld [vmem:[#allocation8 + $0x20] sm:$0xff]  ;;  %s286_s3 = sshll.u32 %s531_s4, 4  ;;  %s287_s3 = int_to_ptr.vmem [resolvable:$true] %s286_s3 }
  0x5e   :  { %330 = vmatprep.mubr.msk.f32.mxu0 %vm98_vm0, %v85_v5  ;;  %v183_v8 = vld [vmem:[#allocation8 + $0x8] sm:$0xff]  ;;  %v184_v9 = vld [vmem:[#allocation8 + $0x10] sm:$0xff]  ;;  %353 = vmatprep.subr.bf16.mxu0 %v352_v3  ;;  %v189_v18 = vld [vmem:[#allocation8 + $0x38] sm:$0xff]  ;;  %s494_s21 = scalar_lea.vmem %s287_s3, 256  ;;  %p499_p13 = scmp.lt.s32.totalorder %s287_s3, %s287_s3 }
  0x5f   :  { %v360_v10 = vpack.c.bf16 %v183_v8, %v182_v7  ;;  %355 = vmatpush3.bf16.msra.mxu0 %v352_v3  ;;  %v364_v12 = vpack.c.bf16 %v185_v11, %v184_v9  ;;  %v187_v14 = vld [vmem:[#allocation8 + $0x28] sm:$0xff]  ;;  %v86_v16 = vld [vmem:[#allocation2 + $0x8] sm:$0xff]  ;;  %v300_v20 = vld [vmem:[#allocation7] ss:$0 sm:$0xff]  ;;  %p495_p12 = scmp.ne.s32.totalorder %s287_s3, %s494_s21  ;;  %p500_p0 = scmp.lt.s32.totalorder %s494_s21, %s494_s21 }
  0x60   :  { %357 = vmatprep.subr.bf16.mxu0 %v356_v6  ;;  %v368_v15 = vpack.c.bf16 %v187_v14, %v186_v13  ;;  %v188_v17 = vld [vmem:[#allocation8 + $0x30] sm:$0xff]  ;;  %v303_v27 = vld [vmem:[#allocation10] ss:$0 sm:$0xff] }
  0x61   :  { %361 = vmatprep.subr.bf16.mxu1 %v360_v10  ;;  %v372_v19 = vpack.c.bf16 %v189_v18, %v188_v17  ;;  %p501_p1 = por %p500_p0, %p499_p13 }
  0x62   :  { %363 = vmatpush3.bf16.msra.mxu1 %v360_v10 }
  0x63   :  { %365 = vmatprep.subr.bf16.mxu1 %v364_v12  ;;  %359 = vmatpush3.bf16.msra.mxu0 %v356_v6  ;;  %p502_p2 = pnand %p501_p1, %p495_p12 }
  0x66   :  { %367 = vmatpush3.bf16.msra.mxu1 %v364_v12  ;;  %331 = vmatmul.mubr.msk.f32.vlgmr.msra.gmra.mrb[0].mxu0 %vm98_vm0, %v86_v16 }
  0x67   :  { %369 = vmatprep.subr.bf16.mxu1 %v368_v15 }
  0x6a   :  { %371 = vmatpush3.bf16.msra.mxu1 %v368_v15 }
  0x6b   :  { %373 = vmatprep.subr.bf16.mxu1 %v372_v19 }
  0x6e   :  { %375 = vmatpush3.bf16.msra.mxu1 %v372_v19 }
 0x139   :  { %v332_v21 = vpop.f32.mrb[0].mxu0 }
 0x13a   :  { %v177_v22 = vadd.f32 %v332_v21, %v300_v20  ;;  %v171_v23 = vpop.f32.mrb[1].mxu0 }
 0x13b   :  { %v172_v24 = vadd.f32 %v300_v20, %v171_v23 }
 0x13c   :  { %v181_v26 = vmax.f32 %v177_v22, 0.0 }
 0x13d   :  { %v180_v25 = vmax.f32 %v172_v24, 0.0 }
 0x13f   :  { %349 = vmatprep.mubr.msk.f32.mxu1 %vm197_vm1, %v180_v25 }
 0x140   :  { %350 = vmatmul.mubr.msk.f32.vlgmr.msra.gmra.mrb[0].mxu1 %vm197_vm1, %v181_v26 }
 0x213   :  { %v351_v28 = vpop.f32.mrb[0].mxu1 }
 0x214   :  { %v276_v29 = vadd.f32 %v351_v28, %v303_v27  ;;  %v270_v30 = vpop.f32.mrb[1].mxu1 }
 0x215   :  { %v271_v31 = vadd.f32 %v303_v27, %v270_v30 }
 0x216   :  { %280 = vst.msk [vmem:[#allocation11 + $0x8] sm:$0xff] %vm98_vm0, %v276_v29 }
 0x217   :  { %279 = vst.msk [vmem:[#allocation11] sm:$0xff] %vm98_vm0, %v271_v31 }
 0x218   :  { %505 = shalt.err (!%p502_p2)
}
 0x219   :  { %s506_s9 = scalar_lea.hbm %s662_s5, 256 }
 0x21a   :  { %p507_p3 = scmp.ne.s32.totalorder %s662_s5, %s506_s9  ;;  %p510_p4 = scmp.lt.u32.totalorder %s506_s9, %s662_s5 }
 0x21c   :  { %p512_p5 = pnand %p510_p4, %p507_p3 }
 0x21e   :  { %515 = shalt.err (!%p512_p5)
}
 0x21f   :  { %292 = dma.vmem_to_hbm [thread:$0]  %s287_s3, 256, %s662_s5, [#allocation4], %s526_s30, %s526_s30, %s527_s6  }
 0x220   :  { %522 = dma.done.wait [#allocation4], 256  }
 0x221   :  { %523 = vsyncadd [#allocation4], 4294967040 }
 0x222   :  { %296 = vsyncpa [#allocation3], 1 }
 0x223   :  { %297 = vsyncpa [#allocation6], 1 }
 0x224   :  { %298 = vsyncpa [#allocation9], 1 }
 0x225   :  { %299 = vsyncpa [#allocation4], 1 }

</bundles_post_ra>
